<compile_context>
chip_gen: v7x
topology: tpu7x:2x2x1
jax: 0.10.0
libtpu: 0.0.40
codegen_flags: <defaults>
</compile_context>

<pallas_src>
import jax
import jax.numpy as jnp
import numpy as np
from jax.experimental import pallas as pl
from jax.experimental.pallas import tpu as pltpu

_NEG_INF = -1e30  # finite stand-in for -inf (avoids inf-inf NaN paths)


def _round_up(x, m):
    return ((x + m - 1) // m) * m


def _pad_axis(x, axis, target):
    pad = target - x.shape[axis]
    if pad == 0:
        return x
    widths = [(0, 0)] * x.ndim
    widths[axis] = (0, pad)
    return jnp.pad(x, widths)


def _device_defaults():
    """Generation-aware defaults: tanh dtype, tile caps, scoped-vmem limit."""
    try:
        kind = jax.devices()[0].device_kind.lower()
    except Exception:
        kind = ""
    if ("v5e" in kind) or ("v5 lite" in kind) or ("v5lite" in kind):
        # No bf16 EUP/VPU -> f32 tanh; 16 MiB scoped default -> smaller K tile
        # + raised vmem limit so the f32 (Qt,Kt,Hp) temp keeps the pipeline up.
        return dict(feat_dtype=jnp.float32, matmul_dtype=jnp.bfloat16,
                    q_tile_cap=128, k_tile_cap=64, vmem_limit=64 << 20,
                    two_tc=False)
    if "v6" in kind:
        # 128 MiB VMEM + bf16 EUP: bf16 tanh, bigger K tile, raised vmem limit.
        return dict(feat_dtype=jnp.bfloat16, matmul_dtype=jnp.bfloat16,
                    q_tile_cap=128, k_tile_cap=256, vmem_limit=96 << 20,
                    two_tc=False)
    if ("v7" in kind) or ("7x" in kind):
        # 64 MiB VMEM: keep 128 tiles, bf16 tanh; 2 TensorCores per chip.
        return dict(feat_dtype=jnp.bfloat16, matmul_dtype=jnp.bfloat16,
                    q_tile_cap=128, k_tile_cap=128, vmem_limit=None,
                    two_tc=True)
    # Unknown (v4 / v5p / interpret): conservative f32 everywhere.
    return dict(feat_dtype=jnp.float32, matmul_dtype=jnp.float32,
                q_tile_cap=128, k_tile_cap=128, vmem_limit=None,
                two_tc=False)


def _make_kernel(k_valid, k_tile, approx_recip):
    def kernel(qp_ref, kp_ref, v_ref, wv_ref, o_ref, m_sc, l_sc, acc_sc):
        ki = pl.program_id(2)

        @pl.when(ki == 0)
        def _init():
            m_sc[...] = jnp.full_like(m_sc, _NEG_INF)
            l_sc[...] = jnp.zeros_like(l_sc)
            acc_sc[...] = jnp.zeros_like(acc_sc)

        # Additive-attention features for this (Q-tile, K-block) only.
        # Projections were hoisted to the wrapper; the add + tanh run in the
        # storage dtype of qp/kp (bf16 on v6e/v7x -> bf16 EUP, f32 on v5e).
        feats = jnp.tanh(qp_ref[0][:, None, :] + kp_ref[0][None, :, :])  # (Qt,Kt,H)

        # H-contraction against w_v on the VPU in f32; it co-issues in spare
        # bundle slots under the EUP tanh stream ("max, not sum").  Move to the
        # MXU only if a bundle dump shows XLU/VALU, not EUP, saturating.
        scores = jnp.sum(feats.astype(jnp.float32) * wv_ref[0][None, None, :],
                         axis=-1)                                        # (Qt,Kt)

        # Mask the zero-padded key positions of the last K block.
        kpos = ki * k_tile + jax.lax.broadcasted_iota(jnp.int32, scores.shape, 1)
        scores = jnp.where(kpos < k_valid, scores, _NEG_INF)

        # Online softmax (flash-attention running max / denom / acc).
        m_prev = m_sc[...]
        m_new = jnp.maximum(m_prev, jnp.max(scores, axis=-1, keepdims=True))
        alpha = jnp.exp(m_prev - m_new)
        p = jnp.exp(scores - m_new)                                      # (Qt,Kt) f32
        l_sc[...] = alpha * l_sc[...] + jnp.sum(p, axis=-1, keepdims=True)
        # p stays f32 for the p @ V matmul (accuracy at large K; MXU has slack).
        acc_sc[...] = alpha * acc_sc[...] + jnp.dot(
            p, v_ref[0].astype(jnp.float32), preferred_element_type=jnp.float32)
        m_sc[...] = m_new

        @pl.when(ki == pl.num_programs(2) - 1)
        def _finalize():
            if approx_recip:
                inv_l = pl.reciprocal(l_sc[...], approx=True)   # EUP, ~free
            else:
                inv_l = 1.0 / l_sc[...]                         # exact path
            o_ref[0] = (acc_sc[...] * inv_l).astype(o_ref.dtype)

    return kernel


def attention_forward(queries, keys, values, w_q, w_k, w_v, *,
                      q_tile=None, k_tile=None,
                      matmul_dtype=None, feat_dtype=None,
                      approx_recip=False, vmem_limit=None):
    """Additive attention forward (eval-mode dropout = identity).

    queries (B,Q,Dq), keys (B,K,Dk), values (B,K,V);
    w_q (H,Dq), w_k (H,Dk), w_v (1,H)  -- PyTorch nn.Linear layout.
    Dtypes / tile sizes default per TPU generation (see _device_defaults);
    pass matmul_dtype=feat_dtype=jnp.float32 for a full-precision path.
    """
    B, Q, Dq = queries.shape
    _, K, Dk = keys.shape
    _, _, V = values.shape
    H = w_q.shape[0]
    assert Q >= 1 and K >= 1
    out_dtype = queries.dtype

    cfg = _device_defaults()
    if matmul_dtype is None:
        matmul_dtype = cfg["matmul_dtype"]
    if feat_dtype is None:
        feat_dtype = cfg["feat_dtype"]
    if vmem_limit is None:
        vmem_limit = cfg["vmem_limit"]

    # Sublane granularity: packed (2-byte) storage needs 16-row tiles.
    itemsizes = (jnp.dtype(feat_dtype).itemsize, jnp.dtype(matmul_dtype).itemsize)
    sub = 16 if min(itemsizes) < 4 else 8

    if q_tile is None:
        q_tile = min(cfg["q_tile_cap"], _round_up(Q, sub))
        if cfg["two_tc"] and B == 1:
            # v7x: keep both TensorCores busy -> aim for >= 2 Q tiles.
            half = _round_up((Q + 1) // 2, sub)
            q_tile = min(q_tile, max(half, sub))
    if k_tile is None:
        k_tile = min(cfg["k_tile_cap"], _round_up(K, sub))

    Qp, Kp = _round_up(Q, q_tile), _round_up(K, k_tile)
    Hp, Vp = _round_up(H, 128), _round_up(V, 128)
    # By construction the last K block always holds >= 1 valid key, so the
    # -1e30 padding mask can never yield an all-masked softmax row.
    assert Kp - K < k_tile

    # Hoisted projections: one XLA GEMM each, f32 accumulation (no per-Q-tile
    # recomputation of k' and no weight DMA inside the grid).
    qp = jnp.einsum("bqd,hd->bqh", queries.astype(matmul_dtype),
                    w_q.astype(matmul_dtype), preferred_element_type=jnp.float32)
    kp = jnp.einsum("bkd,hd->bkh", keys.astype(matmul_dtype),
                    w_k.astype(matmul_dtype), preferred_element_type=jnp.float32)

    # Zero-pad to lane/sublane friendly shapes (lane-dense output stores) and
    # cast to the kernel storage dtypes.  Padded H columns contribute exactly
    # zero (zero w_v); padded K rows are masked before the softmax.
    qp_p = _pad_axis(_pad_axis(qp, 1, Qp), 2, Hp).astype(feat_dtype)
    kp_p = _pad_axis(_pad_axis(kp, 1, Kp), 2, Hp).astype(feat_dtype)
    v_p = _pad_axis(_pad_axis(values, 1, Kp), 2, Vp).astype(matmul_dtype)
    wv_p = _pad_axis(w_v, 1, Hp).astype(jnp.float32)                 # (1, Hp)

    n_q, n_k = Qp // q_tile, Kp // k_tile
    kernel = _make_kernel(K, k_tile, approx_recip)

    cp_kwargs = dict(dimension_semantics=("parallel", "parallel", "arbitrary"))
    if vmem_limit is not None:
        cp_kwargs["vmem_limit_bytes"] = int(vmem_limit)

    out_p = pl.pallas_call(
        kernel,
        out_shape=jax.ShapeDtypeStruct((B, Qp, Vp), out_dtype),
        grid_spec=pltpu.PrefetchScalarGridSpec(
            num_scalar_prefetch=0,
            grid=(B, n_q, n_k),
            in_specs=[
                pl.BlockSpec((1, q_tile, Hp), lambda b, qi, ki: (b, qi, 0)),
                pl.BlockSpec((1, k_tile, Hp), lambda b, qi, ki: (b, ki, 0)),
                pl.BlockSpec((1, k_tile, Vp), lambda b, qi, ki: (b, ki, 0)),
                pl.BlockSpec((1, Hp), lambda b, qi, ki: (0, 0)),
            ],
            out_specs=pl.BlockSpec((1, q_tile, Vp), lambda b, qi, ki: (b, qi, 0)),
            scratch_shapes=[
                pltpu.VMEM((q_tile, 1), jnp.float32),    # running max
                pltpu.VMEM((q_tile, 1), jnp.float32),    # running denominator
                pltpu.VMEM((q_tile, Vp), jnp.float32),   # running output acc
            ],
        ),
        compiler_params=pltpu.CompilerParams(**cp_kwargs),
    )(qp_p, kp_p, v_p, wv_p)

    return out_p[:, :Q, :V]


def attention_reference(queries, keys, values, w_q, w_k, w_v):
    qp = queries @ w_q.T
    kp = keys @ w_k.T
    feats = jnp.tanh(qp[:, :, None, :] + kp[:, None, :, :])
    scores = (feats @ w_v.T)[..., 0]
    attn = jax.nn.softmax(scores, axis=-1)
    return jnp.einsum("bqk,bkv->bqv", attn, values)


if __name__ == "__main__":
    key = jax.random.PRNGKey(0)
    kq, kk, kv, kwq, kwk, kwv = jax.random.split(key, 6)

    B, Q, K = 2, 8, 8
    query_size, key_size, num_hiddens, value_dim = 32, 32, 32, 16

    queries = jax.random.normal(kq, (B, Q, query_size), dtype=jnp.float32)
    keys = jax.random.normal(kk, (B, K, key_size), dtype=jnp.float32)
    values = jax.random.normal(kv, (B, K, value_dim), dtype=jnp.float32)

    # Deterministic parameter init (PyTorch Linear layout: (out, in)).
    w_q = jax.random.normal(kwq, (num_hiddens, query_size), dtype=jnp.float32) * 0.1
    w_k = jax.random.normal(kwk, (num_hiddens, key_size), dtype=jnp.float32) * 0.1
    w_v = jax.random.normal(kwv, (1, num_hiddens), dtype=jnp.float32) * 0.1

    ref = attention_reference(queries, keys, values, w_q, w_k, w_v)

    # 1) Full-f32 path, exact reciprocal: tight numerical check.
    out_f32 = attention_forward(queries, keys, values, w_q, w_k, w_v,
                                matmul_dtype=jnp.float32,
                                feat_dtype=jnp.float32,
                                approx_recip=False)
    out_f32 = jax.block_until_ready(out_f32)
    np.testing.assert_allclose(np.asarray(out_f32), np.asarray(ref),
                               rtol=1e-5, atol=1e-5)

    # 2) Generation-default fast path (bf16 MXU/DMA operands; bf16 tanh on
    #    v6e/v7x, f32 tanh on v5e), approx reciprocal: looser tolerance.
    out_fast = attention_forward(queries, keys, values, w_q, w_k, w_v,
                                 approx_recip=True)
    out_fast = jax.block_until_ready(out_fast)
    np.testing.assert_allclose(np.asarray(out_fast), np.asarray(ref),
                               rtol=5e-2, atol=5e-2)

    print("KERNEL_OK")
</pallas_src>

<mosaic_0001>
module attributes {stable_mosaic.version = 11 : i64} {
  func.func @kernel(%arg0: i32, %arg1: i32, %arg2: i32, %arg3: memref<1x8x128xf32, #tpu.memory_space<vmem>>, %arg4: memref<1x8x128xf32, #tpu.memory_space<vmem>>, %arg5: memref<1x8x128xf32, #tpu.memory_space<vmem>>, %arg6: memref<1x128xf32, #tpu.memory_space<vmem>>, %arg7: memref<1x8x128xf32, #tpu.memory_space<vmem>>, %arg8: memref<8x1xf32, #tpu.memory_space<vmem>>, %arg9: memref<8x1xf32, #tpu.memory_space<vmem>>, %arg10: memref<8x128xf32, #tpu.memory_space<vmem>>) attributes {dimension_semantics = [#tpu.dimension_semantics<parallel>, #tpu.dimension_semantics<parallel>, #tpu.dimension_semantics<arbitrary>], iteration_bounds = array<i64: 2, 1, 1>, scalar_prefetch = 0 : i64, scratch_operands = 3 : i64, tpu.core_type = #tpu.core_type<tc>, window_params = [{transform_indices = @transform_0, window_bounds = array<i64: 1, 8, 128>}, {transform_indices = @transform_1, window_bounds = array<i64: 1, 8, 128>}, {transform_indices = @transform_2, window_bounds = array<i64: 1, 8, 128>}, {pipeline_mode = #tpu.pipeline_mode<synchronous>, transform_indices = @transform_3, window_bounds = array<i64: 1, 128>}, {transform_indices = @transform_4, window_bounds = array<i64: 1, 8, 128>}]} {
    %c0_i32 = arith.constant 0 : i32
    %0 = arith.cmpi eq, %arg2, %c0_i32 : i32
    %1 = arith.extui %0 : i1 to i32
    %c0_i32_0 = arith.constant 0 : i32
    %2 = arith.cmpi ne, %1, %c0_i32_0 : i32
    scf.if %2 {
      %cst_30 = arith.constant -1.000000e+30 : f32
      %54 = vector.broadcast %cst_30 : f32 to vector<8x1xf32>
      %c0_31 = arith.constant 0 : index
      %c0_32 = arith.constant 0 : index
      %55 = vector.load %arg8[%c0_31, %c0_32] : memref<8x1xf32, #tpu.memory_space<vmem>>, vector<8x1xf32>
      tpu.vector_store %arg8[%c0_31, %c0_32], %54 {strides = array<i32>} : memref<8x1xf32, #tpu.memory_space<vmem>>, vector<8x1xf32>,
      %cst_33 = arith.constant 0.000000e+00 : f32
      %56 = vector.broadcast %cst_33 : f32 to vector<8x1xf32>
      %c0_34 = arith.constant 0 : index
      %c0_35 = arith.constant 0 : index
      %57 = vector.load %arg9[%c0_34, %c0_35] : memref<8x1xf32, #tpu.memory_space<vmem>>, vector<8x1xf32>
      tpu.vector_store %arg9[%c0_34, %c0_35], %56 {strides = array<i32>} : memref<8x1xf32, #tpu.memory_space<vmem>>, vector<8x1xf32>,
      %cst_36 = arith.constant 0.000000e+00 : f32
      %58 = vector.broadcast %cst_36 : f32 to vector<8x128xf32>
      %c0_37 = arith.constant 0 : index
      %c0_38 = arith.constant 0 : index
      %59 = vector.load %arg10[%c0_37, %c0_38] : memref<8x128xf32, #tpu.memory_space<vmem>>, vector<8x128xf32>
      tpu.vector_store %arg10[%c0_37, %c0_38], %58 {strides = array<i32>} : memref<8x128xf32, #tpu.memory_space<vmem>>, vector<8x128xf32>,
    } else {
    }
    %c0 = arith.constant 0 : index
    %c0_1 = arith.constant 0 : index
    %c0_2 = arith.constant 0 : index
    %3 = vector.load %arg3[%c0, %c0_1, %c0_2] : memref<1x8x128xf32, #tpu.memory_space<vmem>>, vector<1x8x128xf32>
    %4 = vector.shape_cast %3 : vector<1x8x128xf32> to vector<8x128xf32>
    %5 = vector.shape_cast %4 : vector<8x128xf32> to vector<8x1x128xf32>
    %c0_3 = arith.constant 0 : index
    %c0_4 = arith.constant 0 : index
    %c0_5 = arith.constant 0 : index
    %6 = vector.load %arg4[%c0_3, %c0_4, %c0_5] : memref<1x8x128xf32, #tpu.memory_space<vmem>>, vector<1x8x128xf32>
    %7 = vector.shape_cast %6 : vector<1x8x128xf32> to vector<8x128xf32>
    %8 = vector.shape_cast %7 : vector<8x128xf32> to vector<1x8x128xf32>
    %9 = vector.broadcast %5 : vector<8x1x128xf32> to vector<8x8x128xf32>
    %10 = vector.broadcast %8 : vector<1x8x128xf32> to vector<8x8x128xf32>
    %11 = arith.addf %9, %10 : vector<8x8x128xf32>
    %12 = math.tanh %11 : vector<8x8x128xf32>
    %c0_6 = arith.constant 0 : index
    %c0_7 = arith.constant 0 : index
    %13 = vector.load %arg6[%c0_6, %c0_7] : memref<1x128xf32, #tpu.memory_space<vmem>>, vector<1x128xf32>
    %14 = vector.shape_cast %13 : vector<1x128xf32> to vector<128xf32>
    %15 = vector.shape_cast %14 : vector<128xf32> to vector<1x1x128xf32>
    %16 = vector.broadcast %15 : vector<1x1x128xf32> to vector<8x8x128xf32>
    %17 = arith.mulf %12, %16 : vector<8x8x128xf32>
    %cst = arith.constant dense<0.000000e+00> : vector<8x8xf32>
    %18 = vector.multi_reduction <add>, %17, %cst [2] : vector<8x8x128xf32> to vector<8x8xf32>
    %c8_i32 = arith.constant 8 : i32
    %19 = arith.muli %arg2, %c8_i32 : i32
    %20 = tpu.iota {dimensions = array<i32: 1>} : vector<8x8xi32>
    %21 = vector.broadcast %19 : i32 to vector<8x8xi32>
    %22 = arith.addi %21, %20 : vector<8x8xi32>
    %c8_i32_8 = arith.constant 8 : i32
    %23 = vector.broadcast %c8_i32_8 : i32 to vector<8x8xi32>
    %24 = arith.cmpi slt, %22, %23 : vector<8x8xi32>
    %cst_9 = arith.constant -1.000000e+30 : f32
    %25 = vector.broadcast %cst_9 : f32 to vector<8x8xf32>
    %26 = arith.select %24, %18, %25 : vector<8x8xi1>, vector<8x8xf32>
    %c0_10 = arith.constant 0 : index
    %c0_11 = arith.constant 0 : index
    %27 = vector.load %arg8[%c0_10, %c0_11] : memref<8x1xf32, #tpu.memory_space<vmem>>, vector<8x1xf32>
    %cst_12 = arith.constant dense<0xFF800000> : vector<8xf32>
    %28 = vector.multi_reduction <maximumf>, %26, %cst_12 [1] : vector<8x8xf32> to vector<8xf32>
    %29 = vector.shape_cast %28 : vector<8xf32> to vector<8x1xf32>
    %30 = arith.maximumf %27, %29 : vector<8x1xf32>
    %31 = arith.subf %27, %30 : vector<8x1xf32>
    %32 = math.exp %31 : vector<8x1xf32>
    %33 = vector.broadcast %30 : vector<8x1xf32> to vector<8x8xf32>
    %34 = arith.subf %26, %33 : vector<8x8xf32>
    %35 = math.exp %34 : vector<8x8xf32>
    %c0_13 = arith.constant 0 : index
    %c0_14 = arith.constant 0 : index
    %36 = vector.load %arg9[%c0_13, %c0_14] : memref<8x1xf32, #tpu.memory_space<vmem>>, vector<8x1xf32>
    %37 = arith.mulf %32, %36 : vector<8x1xf32>
    %cst_15 = arith.constant dense<0.000000e+00> : vector<8xf32>
    %38 = vector.multi_reduction <add>, %35, %cst_15 [1] : vector<8x8xf32> to vector<8xf32>
    %39 = vector.shape_cast %38 : vector<8xf32> to vector<8x1xf32>
    %40 = arith.addf %37, %39 : vector<8x1xf32>
    %c0_16 = arith.constant 0 : index
    %c0_17 = arith.constant 0 : index
    %41 = vector.load %arg9[%c0_16, %c0_17] : memref<8x1xf32, #tpu.memory_space<vmem>>, vector<8x1xf32>
    tpu.vector_store %arg9[%c0_16, %c0_17], %40 {strides = array<i32>} : memref<8x1xf32, #tpu.memory_space<vmem>>, vector<8x1xf32>,
    %c0_18 = arith.constant 0 : index
    %c0_19 = arith.constant 0 : index
    %42 = vector.load %arg10[%c0_18, %c0_19] : memref<8x128xf32, #tpu.memory_space<vmem>>, vector<8x128xf32>
    %43 = vector.broadcast %32 : vector<8x1xf32> to vector<8x128xf32>
    %44 = arith.mulf %43, %42 : vector<8x128xf32>
    %c0_20 = arith.constant 0 : index
    %c0_21 = arith.constant 0 : index
    %c0_22 = arith.constant 0 : index
    %45 = vector.load %arg5[%c0_20, %c0_21, %c0_22] : memref<1x8x128xf32, #tpu.memory_space<vmem>>, vector<1x8x128xf32>
    %46 = vector.shape_cast %45 : vector<1x8x128xf32> to vector<8x128xf32>
    %cst_23 = arith.constant dense<0.000000e+00> : vector<8x128xf32>
    %47 = tpu.matmul %35, %46, %cst_23 {dimension_numbers = #tpu.dot_dimension_numbers<[1], [0], [0], [1], [0, 0, 1, 1], [], []>} : vector<8x8xf32>, vector<8x128xf32>, vector<8x128xf32> -> vector<8x128xf32>
    %48 = arith.addf %44, %47 : vector<8x128xf32>
    %c0_24 = arith.constant 0 : index
    %c0_25 = arith.constant 0 : index
    %49 = vector.load %arg10[%c0_24, %c0_25] : memref<8x128xf32, #tpu.memory_space<vmem>>, vector<8x128xf32>
    tpu.vector_store %arg10[%c0_24, %c0_25], %48 {strides = array<i32>} : memref<8x128xf32, #tpu.memory_space<vmem>>, vector<8x128xf32>,
    %c0_26 = arith.constant 0 : index
    %c0_27 = arith.constant 0 : index
    %50 = vector.load %arg8[%c0_26, %c0_27] : memref<8x1xf32, #tpu.memory_space<vmem>>, vector<8x1xf32>
    tpu.vector_store %arg8[%c0_26, %c0_27], %30 {strides = array<i32>} : memref<8x1xf32, #tpu.memory_space<vmem>>, vector<8x1xf32>,
    %c0_i32_28 = arith.constant 0 : i32
    %51 = arith.cmpi eq, %arg2, %c0_i32_28 : i32
    %52 = arith.extui %51 : i1 to i32
    %c0_i32_29 = arith.constant 0 : i32
    %53 = arith.cmpi ne, %52, %c0_i32_29 : i32
    scf.if %53 {
      %c0_30 = arith.constant 0 : index
      %c0_31 = arith.constant 0 : index
      %54 = vector.load %arg9[%c0_30, %c0_31] : memref<8x1xf32, #tpu.memory_space<vmem>>, vector<8x1xf32>
      %cst_32 = arith.constant 1.000000e+00 : f32
      %55 = vector.broadcast %cst_32 : f32 to vector<8x1xf32>
      %56 = arith.divf %55, %54 : vector<8x1xf32>
      %c0_33 = arith.constant 0 : index
      %c0_34 = arith.constant 0 : index
      %57 = vector.load %arg10[%c0_33, %c0_34] : memref<8x128xf32, #tpu.memory_space<vmem>>, vector<8x128xf32>
      %58 = vector.broadcast %56 : vector<8x1xf32> to vector<8x128xf32>
      %59 = arith.mulf %57, %58 : vector<8x128xf32>
      %c0_35 = arith.constant 0 : index
      %c0_36 = arith.constant 0 : index
      %c0_37 = arith.constant 0 : index
      %60 = vector.load %arg7[%c0_35, %c0_36, %c0_37] : memref<1x8x128xf32, #tpu.memory_space<vmem>>, vector<1x8x128xf32>
      %61 = vector.shape_cast %60 : vector<1x8x128xf32> to vector<8x128xf32>
      %62 = vector.shape_cast %59 : vector<8x128xf32> to vector<1x8x128xf32>
      tpu.vector_store %arg7[%c0_35, %c0_36, %c0_37], %62 {strides = array<i32>} : memref<1x8x128xf32, #tpu.memory_space<vmem>>, vector<1x8x128xf32>,
    } else {
    }
    return
  }
  func.func @transform_0(%arg0: i32, %arg1: i32, %arg2: i32) -> (i32, i32, i32) {
    %c0_i32 = arith.constant 0 : i32
    %c0_i32_0 = arith.constant 0 : i32
    return %arg0, %arg1, %c0_i32 : i32, i32, i32
  }
  func.func @transform_1(%arg0: i32, %arg1: i32, %arg2: i32) -> (i32, i32, i32) {
    %c0_i32 = arith.constant 0 : i32
    %c0_i32_0 = arith.constant 0 : i32
    return %arg0, %arg2, %c0_i32 : i32, i32, i32
  }
  func.func @transform_2(%arg0: i32, %arg1: i32, %arg2: i32) -> (i32, i32, i32) {
    %c0_i32 = arith.constant 0 : i32
    %c0_i32_0 = arith.constant 0 : i32
    return %arg0, %arg2, %c0_i32 : i32, i32, i32
  }
  func.func @transform_3(%arg0: i32, %arg1: i32, %arg2: i32) -> (i32, i32) {
    %c0_i32 = arith.constant 0 : i32
    %c0_i32_0 = arith.constant 0 : i32
    %c0_i32_1 = arith.constant 0 : i32
    return %c0_i32, %c0_i32_0 : i32, i32
  }
  func.func @transform_4(%arg0: i32, %arg1: i32, %arg2: i32) -> (i32, i32, i32) {
    %c0_i32 = arith.constant 0 : i32
    %c0_i32_0 = arith.constant 0 : i32
    return %arg0, %arg1, %c0_i32 : i32, i32, i32
  }
}

</mosaic_0001>

<bundles_post_ra>
// kernel: tpu_custom_call.1
= control target key start
LH: loop header
LB: loop body
LE: loop exit
PB: predicated region body
PF: predicated region fallthrough
CT: control target
= control target key end

     0   :  { %s1419_s0 = inlined_call_operand.hbm [shape: f32[2,8,128], index: 0, kind: input, shape index: {}]   ;;  %s1420_s1 = inlined_call_operand.hbm [shape: f32[2,8,128], index: 1, kind: input, shape index: {}]   ;;  %s1421_s2 = inlined_call_operand.hbm [shape: f32[2,8,128], index: 2, kind: input, shape index: {}]   ;;  %s1422_s3 = inlined_call_operand.vmem [shape: f32[1,128], index: 3, kind: input, shape index: {}]   ;;  %s1423_s4 = inlined_call_operand.hbm [shape: f32[2,8,128], index: 4, kind: output, shape index: {}]  }
   0x1   :  { %1432 = sst [smem:[#allocation19_spill]] %s1420_s1 }
   0x2   :  { %9 = vsyncpa [#allocation6], 0 }
   0x3   :  { %11 = vsyncpa [#allocation6 + $0x1], 0 }
   0x4   :  { %12 = vsyncpa [#allocation9], 0 }
   0x5   :  { %14 = vsyncpa [#allocation9 + $0x1], 0 }
   0x6   :  { %15 = vsyncpa [#allocation7], 0 }
   0x7   :  { %17 = vsyncpa [#allocation7 + $0x1], 0  ;;  %s1131_s15 = smov 0   ;;  %s1133_s16 = smov 0  }
   0x8   :  { %s1135_s17 = smov 0   ;;  %s1137_s18 = smov 0  }
   0x9   :  { %s1139_s19 = smov 0   ;;  %s1141_s20 = smov 0  }
   0xa LB: > { %1433 = sst [smem:[#allocation15_spill]] %s1091_s19  ;;  %s1162_s21 = sadd.s32 4294967295, %s1095_s20   ;;  %s1095_s20 = sphi %s1141_s20, %s23_s20   ;;  %s1091_s19 = sphi %s1139_s19, %s1457_s19   ;;  %s1087_s18 = sphi %s1137_s18, %s1456_s18   ;;  %s1083_s17 = sphi %s1135_s17, %s1460_s17   ;;  %s1079_s16 = sphi %s1133_s16, %s1459_s16   ;;  %s1075_s15 = sphi %s1131_s15, %s1458_s15  }
   0xb   : > { %1434 = sst [smem:[#allocation16_spill]] %s1095_s20  ;;  %s790_s22 = sadd.s32 4294967294, %s1095_s20  }
   0xc   : > { %s42_s23 = sadd.s32 1, %s1091_s19  ;;  %s51_s24 = sadd.s32 1, %s1083_s17 }
   0xd   : > { %p44_p0 = scmp.ge.s32.totalorder %s42_s23, 2  ;;  %p58_p1 = scmp.ne.s32.totalorder %s1083_s17, %s1079_s16 }
   0xe   : > { %p59_p2 = scmp.eq.s32.totalorder %s1095_s20, 0  ;;  %p64_p3 = scmp.ne.s32.totalorder %s1079_s16, %s1075_s15 }
   0xf   : > { %s1462_s23 = smov (%p44_p0, %s42_s23), 0  ;;  %p65_p5 = scmp.eq.s32.totalorder %s1162_s21, 0 }
  0x10   : > { %1435 = sst [smem:[#allocation17_spill]] %s1462_s23  ;;  %p1174_p4 = por %p59_p2, %p58_p1 }
  0x11   : > { %s46_s26 = ssub.s32 %s1091_s19, %s1462_s23  ;;  %p167_p6 = scmp.eq.s32.totalorder %s1162_s21, 1 }
  0x12   : > { %p49_p7 = scmp.eq.s32.totalorder %s46_s26, 0  ;;  %p1182_p8 = por %p65_p5, %p64_p3 }
  0x13   : > { %p1186_p9 = por %p167_p6, %p58_p1  ;;  %p173_p10 = scmp.eq.s32.totalorder %s790_s22, 1 }
  0x14   : > { %s1437_s27 = scalar_select %p1182_p8, 1, 0 }
  0x15   : > { %s1438_s28 = scalar_select %p1186_p9, 1, 0 }
  0x16   : > { %s1191_s29 = scalar_select %p49_p7, %s1083_s17, %s51_s24  }
  0x17   : > { %p1193_p11 = por %p173_p10, %p64_p3  ;;  %p839_p13 = scmp.lt.s32.totalorder %s1095_s20, 2 }
  0x18   : > { %1439 = sst [smem:[#allocation18_spill]] %s1191_s29  ;;  %s1424_s5 = sand.u32 1, %s1083_s17  }
  0x19   : > { %s1440_s30 = scalar_select %p1193_p11, 1, 0 }
  0x1a   : > { %s1202_s6 = sshll.u32 %s1424_s5, 3  ;;  %s1205_s7 = sshll.u32 %s1091_s19, 7 }
  0x1b   : > { %p1209_p0 = pnand %p839_p13, %p1174_p4  ;;  %s215_s9 = sand.u32 1, %s1095_s20  }
  0x1c   : > { %s1442_s1 = sld [smem:[#allocation19_spill]]  ;;  %s219_s13 = scalar_lea.vmem [#allocation8], %s1202_s6 }
  0x1d   : > { %s1441_s8 = scalar_select %p1209_p0, 1, 0 }
  0x1e   : > { %s227_s14 = sshll.u32 %s219_s13, 4  ;;  %s1225_s22 = scalar_lea.sflag [#allocation9], %s215_s9  ;;  %s1222_s14 = int_to_ptr.vmem [resolvable:$true] %s227_s14 }
  0x1f   : > { %p1231_p4 = pneg %p1209_p0 }
  0x22   : > { %s1218_s12 = scalar_lea.hbm %s1442_s1, %s1205_s7  ;;  %s924_s11 = scalar_lea.hbm %s1442_s1, 256 }
  0x23   : > { %s919_s24 = scalar_lea.hbm %s1218_s12, 128  ;;  %p925_p7 = scmp.lt.u32.totalorder %s1218_s12, %s1442_s1 }
  0x24   : > { %p920_p3 = scmp.ne.s32.totalorder %s1218_s12, %s919_s24  ;;  %p926_p10 = scmp.lt.u32.totalorder %s924_s11, %s919_s24 }
  0x25   : > { %p928_p12 = scmp.lt.u32.totalorder %s919_s24, %s1218_s12 }
  0x26   : > { %p922_p5 = pnand %p1231_p4, %p920_p3  ;;  %p927_p13 = por %p926_p10, %p925_p7 }
  0x28   : > { %p923_p6 = pneg %p922_p5  ;;  %p929_p1 = por %p928_p12, %p927_p13 }
  0x2a   : > { %p930_p2 = pnand %p929_p1, %p923_p6 }
  0x2c   : > { %933 = shalt.err (!%p930_p2)
}
  0x2d   : > { %s934_s9 = scalar_lea.vmem %s1222_s14, 128  ;;  %s1097_s26 = smov [#allocation8]  }
  0x2e   : > { %p935_p3 = scmp.ne.s32.totalorder %s1222_s14, %s934_s9  ;;  %s939_s10 = sshll.u32 %s1097_s26, 4  ;;  %s940_s10 = int_to_ptr.vmem [resolvable:$false] %s939_s10 }
  0x2f   : > { %s941_s5 = scalar_lea.vmem %s940_s10, 256  ;;  %p942_p9 = scmp.lt.s32.totalorder %s1222_s14, %s940_s10 }
  0x30   : > { %p937_p5 = pnand %p935_p3, %p1231_p4  ;;  %p943_p8 = scmp.lt.s32.totalorder %s941_s5, %s934_s9 }
  0x32   : > { %p938_p11 = pneg %p937_p5  ;;  %p944_p7 = por %p943_p8, %p942_p9 }
  0x34   : > { %p945_p10 = pnand %p944_p7, %p938_p11 }
  0x36   : > { %948 = shalt.err (!%p945_p10)
}
  0x37   : > { %831 = dma.hbm_to_vmem [thread:$0]  (!%p1209_p0), %s1218_s12, 128, %s1222_s14, %s1225_s22  }
  0x38   : > { %p1444_p12 = scmp.lt.s32.totalorder %s1095_s20, 3  ;;  %p1445_p1 = scmp.ge.s32.totalorder %s1095_s20, 1 }
  0x39   : > { %s1267_s9 = scalar_lea.hbm %s1419_s0, %s1205_s7  ;;  %s200_s26 = scalar_lea.vmem [#allocation5], %s1202_s6 }
  0x3a   : > { %p1259_p2 = pnand %p1445_p1, %p1444_p12  ;;  %s208_s10 = sshll.u32 %s200_s26, 4  ;;  %s1270_s10 = int_to_ptr.vmem [resolvable:$true] %s208_s10 }
  0x3b   : > { %s1276_s5 = scalar_lea.hbm %s1421_s2, %s1205_s7  ;;  %s1447_s1 = sand.u32 1, %s1083_s17  }
  0x3c   : > { %s1446_s24 = scalar_select %p1259_p2, 1, 0 }
  0x3d   : > { %s197_s23 = scalar_lea.sflag [#allocation6], %s1447_s1  ;;  %s949_s19 = scalar_lea.hbm %s1267_s9, 128 }
  0x3e   : > { %p950_p8 = scmp.ne.s32.totalorder %s1267_s9, %s949_s19  ;;  %s954_s29 = scalar_lea.hbm %s1419_s0, 256 }
  0x3f   : > { %p955_p6 = scmp.lt.u32.totalorder %s1267_s9, %s1419_s0  ;;  %p956_p13 = scmp.lt.u32.totalorder %s954_s29, %s949_s19 }
  0x40   : > { %p952_p9 = pnand %p950_p8, %p1231_p4  ;;  %p958_p5 = scmp.lt.u32.totalorder %s949_s19, %s1267_s9 }
  0x41   : > { %p957_p3 = por %p956_p13, %p955_p6 }
  0x42   : > { %p953_p11 = pneg %p952_p9 }
  0x43   : > { %p959_p7 = por %p958_p5, %p957_p3 }
  0x45   : > { %p960_p10 = pnand %p959_p7, %p953_p11 }
  0x47   : > { %963 = shalt.err (!%p960_p10)
}
  0x48   : > { %s964_s1 = scalar_lea.vmem %s1270_s10, 128  ;;  %s1098_s7 = smov [#allocation5]  }
  0x49   : > { %p965_p12 = scmp.ne.s32.totalorder %s1270_s10, %s964_s1  ;;  %s969_s12 = sshll.u32 %s1098_s7, 4  ;;  %s970_s12 = int_to_ptr.vmem [resolvable:$false] %s969_s12 }
  0x4a   : > { %s971_s20 = scalar_lea.vmem %s970_s12, 256  ;;  %p972_p9 = scmp.lt.s32.totalorder %s1270_s10, %s970_s12 }
  0x4b   : > { %p967_p1 = pnand %p965_p12, %p1231_p4  ;;  %p973_p2 = scmp.lt.s32.totalorder %s971_s20, %s964_s1 }
  0x4d   : > { %p968_p8 = pneg %p967_p1  ;;  %p974_p6 = por %p973_p2, %p972_p9 }
  0x4f   : > { %p975_p13 = pnand %p974_p6, %p968_p8 }
  0x51   : > { %978 = shalt.err (!%p975_p13)
}
  0x52   : > { %828 = dma.hbm_to_vmem [thread:$0]  (!%p1209_p0), %s1267_s9, 128, %s1270_s10, %s197_s23  }
  0x53   : > { %s238_s19 = scalar_lea.vmem [#allocation10], %s1202_s6  ;;  %s979_s14 = scalar_lea.hbm %s1276_s5, 128 }
  0x54   : > { %s246_s29 = sshll.u32 %s238_s19, 4  ;;  %p980_p11 = scmp.ne.s32.totalorder %s1276_s5, %s979_s14  ;;  %s247_s29 = int_to_ptr.vmem [resolvable:$true] %s246_s29 }
  0x55   : > { %s984_s26 = scalar_lea.hbm %s1421_s2, 256  ;;  %p985_p5 = scmp.lt.u32.totalorder %s1276_s5, %s1421_s2 }
  0x56   : > { %p982_p2 = pnand %p980_p11, %p1231_p4  ;;  %p986_p7 = scmp.lt.u32.totalorder %s984_s26, %s979_s14 }
  0x57   : > { %p988_p12 = scmp.lt.u32.totalorder %s979_s14, %s1276_s5 }
  0x58   : > { %p983_p3 = pneg %p982_p2  ;;  %p987_p10 = por %p986_p7, %p985_p5 }
  0x5a   : > { %p989_p1 = por %p988_p12, %p987_p10 }
  0x5c   : > { %p990_p8 = pnand %p989_p1, %p983_p3 }
  0x5e   : > { %993 = shalt.err (!%p990_p8)
}
  0x5f   : > { %s994_s23 = scalar_lea.vmem %s247_s29, 128  ;;  %s1099_s6 = smov [#allocation10]  }
  0x60   : > { %p995_p9 = scmp.ne.s32.totalorder %s247_s29, %s994_s23  ;;  %s999_s9 = sshll.u32 %s1099_s6, 4  ;;  %s1000_s9 = int_to_ptr.vmem [resolvable:$false] %s999_s9 }
  0x61   : > { %s1001_s10 = scalar_lea.vmem %s1000_s9, 256  ;;  %p1002_p11 = scmp.lt.s32.totalorder %s247_s29, %s1000_s9 }
  0x62   : > { %p997_p6 = pnand %p995_p9, %p1231_p4  ;;  %p1003_p2 = scmp.lt.s32.totalorder %s1001_s10, %s994_s23 }
  0x64   : > { %p998_p13 = pneg %p997_p6  ;;  %p1004_p0 = por %p1003_p2, %p1002_p11 }
  0x66   : > { %p1005_p5 = pnand %p1004_p0, %p998_p13 }
  0x68   : > { %1008 = shalt.err (!%p1005_p5)
}
  0x69   : > { %p1448_p7 = scmp.ne.s32.totalorder %s1441_s8, 0  ;;  %p1449_p3 = scmp.ne.s32.totalorder %s1446_s24, 0 }
  0x6a   : > { %s1323_s25 = sand.u32 (!%p1449_p3), 1, %s1079_s16   ;;  %p1450_p0 = scmp.ne.s32.totalorder (!%p1449_p3), %s1437_s27, 0 }
  0x6b   : > { %834 = dma.hbm_to_vmem [thread:$0]  (!%p1448_p7), %s1276_s5, 128, %s247_s29, %s1225_s22  }
  0x6c   : > { %255 = sbr.rel (%p1449_p3) target bundleno = 903 (0x387), region = 36  ;;  %s1326_s12 = sshll.u32 (!%p1449_p3), %s1323_s25, 3 }
  0x6d   : > { %s258_s20 = scalar_lea.sflag (!%p1449_p3), [#allocation6], %s1323_s25  ;;  %s261_s19 = scalar_lea.vmem (!%p1449_p3), [#allocation5], %s1326_s12 }
  0x73   : > { %1062 = dma.done.wait (%p1450_p0), %s258_s20, 128  }
  0x74   : > { %1064 = vsyncadd (%p1450_p0), %s258_s20, 4294967168  ;;  %s266_s8 = sand.u32 1, %s1162_s21   ;;  %s270_s24 = scalar_lea.vmem [#allocation8], %s1326_s12 }
  0x75   : > { %s267_s22 = scalar_lea.sflag [#allocation9], %s266_s8 }
  0x76   : > { %1066 = dma.done.wait (%p1450_p0), %s267_s22, 256  }
  0x77   : > { %1068 = vsyncadd (%p1450_p0), %s267_s22, 4294967040  ;;  %v328_v0 = vlaneseq  ;;  %v1100_v1 = vmov 1966171168   ;;  %v322_v8 = vld [vmem:[%s261_s19] sm:$0xff]  ;;  %v373_v15 = vld [vmem:[%s270_s24] sm:$0xff]  ;;  %vm318_vm0 = vcmask 7168  }
  0x78   : > { %v326_v2 = vunpack.c.l.s4 %v1100_v1  ;;  %v324_v11 = vcombine.high %v322_v8, %v322_v8  ;;  %v804_v40 = vld [vmem:[%s1422_s3] ss:$0 sm:$0xff]  ;;  %v1101_v57 = vmov -1e+30   ;;  %vm507_vm1 = vcmask 1041409   ;;  %s279_s5 = scalar_lea.vmem [#allocation10], %s1326_s12 }
  0x79   : > { %v329_v3 = vshrl.u32 %v328_v0, 7  ;;  %v1340_v4 = vand.u32 127, %v328_v0  ;;  %319 = vst.msk [vmem:[#allocation2] sm:$0xff] %vm318_vm0, %v1101_v57  ;;  %vm509_vm2 = vcmask 1042434   ;;  %vm511_vm3 = vcmask 1043459   ;;  %s807_s29 = sshll.u32 %s1087_s18, 7 }
  0x7a   : > { %v327_v5 = vunpack.c.0.s8 %v326_v2  ;;  %vm513_vm4 = vcmask 1044484   ;;  %vm515_vm5 = vcmask 1045509   ;;  %vm517_vm6 = vcmask 1046534   ;;  %s313_s14 = scalar_lea.vmem [#allocation11], %s1326_s12  ;;  %s1370_s1 = scalar_lea.hbm %s1423_s4, %s807_s29 }
  0x7b   : > { %v1343_v6 = vsub.s32 %v1340_v4, %v329_v3  ;;  %v376_v10 = vsub.s32 0, %v329_v3  ;;  %vm519_vm7 = vcmask 1047559   ;;  %vm466_vm8 = vcmp.lt.s32.totalorder %v1340_v4, 8  ;;  %v555_v4 = vld [vmem:[%s279_s5] sm:$0xff]  ;;  %s661_s11 = sshll.u32 %s313_s14, 4  ;;  %s647_s7 = scalar_lea.sflag [#allocation7], %s1323_s25  ;;  %s1372_s11 = int_to_ptr.vmem [resolvable:$true] %s661_s11 }
  0x7c   : > { %v330_v7 = vsub.s32 %v327_v5, %v329_v3  ;;  %vm524_vm9 = vcmask 64512   ;;  %vm1104_vm10 = vmmov 0   ;;  %s1009_s23 = scalar_lea.vmem %s1372_s11, 128  ;;  %p1451_p10 = scmp.ne.s32.totalorder %s1438_s28, 0 }
  0x7d   : > { %p1010_p4 = scmp.ne.s32.totalorder %s1372_s11, %s1009_s23  ;;  %s1105_s18 = smov [#allocation11]  }
  0x7e   : > { %v331_v9 = vrot.slane %v322_v8, %v330_v7  ;;  %v338_v14 = vrot.slane %v324_v11, %v330_v7  ;;  %s1013_s6 = sshll.u32 %s1105_s18, 4  ;;  %s1014_s6 = int_to_ptr.vmem [resolvable:$false] %s1013_s6 }
  0x7f   : > { %p1011_p12 = pnand %p1010_p4, %p1451_p10  ;;  %s1015_s9 = scalar_lea.vmem %s1014_s6, 256 }
  0x80   : > { %v347_v12 = vrot.slane %v331_v9, %v330_v7  ;;  %v339_v13 = vcombine.high %v331_v9, %v331_v9  ;;  %v354_v19 = vrot.slane %v338_v14, %v330_v7  ;;  %v340_v20 = vcombine.high %v338_v14, %v338_v14  ;;  %p1016_p8 = scmp.lt.s32.totalorder %s1372_s11, %s1014_s6  ;;  %p1017_p9 = scmp.lt.s32.totalorder %s1015_s9, %s1009_s23 }
  0x81   : > { %p1012_p1 = pneg %p1011_p12 }
  0x82   : > { %v377_v16 = vrot.slane %v347_v12, %v376_v10  ;;  %v369_v17 = vcombine.high %v347_v12, %v347_v12  ;;  %v361_v18 = vrot.slane %v339_v13, %v330_v7  ;;  %v393_v25 = vrot.slane %v354_v19, %v376_v10  ;;  %p1018_p6 = por %p1017_p9, %p1016_p8 }
  0x83   : > { %v368_v26 = vrot.slane %v340_v20, %v330_v7  ;;  %v370_v27 = vcombine.high %v354_v19, %v354_v19 }
  0x84   : > { %v414_v21 = vadd.f32 %v377_v16, %v373_v15  ;;  %v385_v22 = vrot.slane %v369_v17, %v376_v10  ;;  %v381_v23 = vrot.slane %v361_v18, %v376_v10  ;;  %v371_v24 = vcombine.high %v361_v18, %v361_v18  ;;  %p1019_p13 = pnand %p1018_p6, %p1012_p1 }
  0x85   : > { %v418_v31 = vadd.f32 %v393_v25, %v373_v15  ;;  %v397_v32 = vrot.slane %v368_v26, %v376_v10  ;;  %v401_v33 = vrot.slane %v370_v27, %v376_v10  ;;  %v372_v34 = vcombine.high %v368_v26, %v368_v26 }
  0x86   : > { %897 = vtanh.f32 %v414_v21  ;;  %v416_v28 = vadd.f32 %v385_v22, %v373_v15  ;;  %v415_v29 = vadd.f32 %v381_v23, %v373_v15  ;;  %v389_v30 = vrot.slane %v371_v24, %v376_v10  ;;  %v523_v23 = vld [vmem:[#allocation2] sm:$0xff] }
  0x87   : > { %v419_v36 = vadd.f32 %v397_v32, %v373_v15  ;;  %v405_v37 = vrot.slane %v372_v34, %v376_v10  ;;  %v420_v38 = vadd.f32 %v401_v33, %v373_v15  ;;  %v1102_v21 = vmov 0  }
  0x88   : > { %899 = vtanh.f32 %v416_v28  ;;  %v417_v35 = vadd.f32 %v389_v30, %v373_v15  ;;  %894 = vset.pattern.permute.xlu1 %v1102_v21  ;;  %895 = vset.pattern.permute.xlu0 %v1102_v21  ;;  %v1103_v22 = vmov 0.0  }
  0x89   : > { %901 = vtanh.f32 %v415_v29  ;;  %v421_v39 = vadd.f32 %v405_v37, %v373_v15  ;;  %320 = vst.msk [vmem:[#allocation3] sm:$0xff] %vm318_vm0, %v1103_v22  ;;  %812 = vmatprep.subr.mxu0 %v1103_v22  ;;  %814 = vmatprep.mubr.msk.f32.mxu0 %vm1104_vm10, %v1103_v22 }
  0x8a   : > { %903 = vtanh.f32 %v417_v35  ;;  %813 = vmatpush3.msra.mxu0 %v555_v4 }
  0x8b   : > { %905 = vtanh.f32 %v418_v31 }
  0x8c   : > { %907 = vtanh.f32 %v419_v36 }
  0x8d   : > { %909 = vtanh.f32 %v420_v38 }
  0x8e   : > { %911 = vtanh.f32 %v421_v39 }
  0x90   : > { %v898_v41 = vpop.eup %897  ;;  %v540_v33 = vld [vmem:[#allocation3] sm:$0xff] }
  0x91   : > { %v437_v42 = vmul.f32 %v898_v41, %v804_v40 }
  0x92   : > { %v900_v43 = vpop.eup %899 }
  0x93   : > { %v902_v44 = vpop.eup %901  ;;  %445 = vadd.xlane.f32.xlu0 %v437_v42  ;;  %v439_v45 = vmul.f32 %v900_v43, %v804_v40 }
  0x94   : > { %v904_v46 = vpop.eup %903  ;;  %v438_v47 = vmul.f32 %v902_v44, %v804_v40 }
  0x95   : > { %v906_v48 = vpop.eup %905  ;;  %449 = vadd.xlane.f32.xlu1 %v439_v45  ;;  %v440_v49 = vmul.f32 %v904_v46, %v804_v40 }
  0x96   : > { %v908_v50 = vpop.eup %907  ;;  %v441_v51 = vmul.f32 %v906_v48, %v804_v40 }
  0x97   : > { %447 = vadd.xlane.f32.xlu0 %v438_v47  ;;  %v910_v52 = vpop.eup %909  ;;  %v442_v53 = vmul.f32 %v908_v50, %v804_v40 }
  0x98   : > { %v912_v54 = vpop.eup %911  ;;  %v443_v55 = vmul.f32 %v910_v52, %v804_v40 }
  0x99   : > { %451 = vadd.xlane.f32.xlu1 %v440_v49  ;;  %v444_v56 = vmul.f32 %v912_v54, %v804_v40 }
  0x9b   : > { %453 = vadd.xlane.f32.xlu0 %v441_v51 }
  0x9d   : > { %455 = vadd.xlane.f32.xlu1 %v442_v53 }
  0x9f   : > { %457 = vadd.xlane.f32.xlu0 %v443_v55 }
  0xa1   : > { %459 = vadd.xlane.f32.xlu1 %v444_v56 }
 0x120   : > { %v446_v58 = vpop.xlane.xlu0 %445 }
 0x121   : > { %v478_v61 = vrot.slane %v446_v58, %v1343_v6 }
 0x122   : > { %v450_v59 = vpop.xlane.xlu1 %449 }
 0x123   : > { %v486_v63 = vrot.slane %v450_v59, %v1343_v6 }
 0x124   : > { %v448_v60 = vpop.xlane.xlu0 %447 }
 0x125   : > { %v482_v62 = vrot.slane %v448_v60, %v1343_v6 }
 0x126   : > { %v452_v0 = vpop.xlane.xlu1 %451 }
 0x127   : > { %v508_v1 = vsel %vm507_vm1, %v482_v62, %v478_v61  ;;  %v490_v2 = vrot.slane %v452_v0, %v1343_v6 }
 0x128   : > { %v510_v3 = vsel %vm509_vm2, %v486_v63, %v508_v1  ;;  %v454_v5 = vpop.xlane.xlu0 %453 }
 0x129   : > { %v512_v7 = vsel %vm511_vm3, %v490_v2, %v510_v3  ;;  %v494_v8 = vrot.slane %v454_v5, %v1343_v6 }
 0x12a   : > { %v456_v9 = vpop.xlane.xlu1 %455 }
 0x12b   : > { %v514_v10 = vsel %vm513_vm4, %v494_v8, %v512_v7  ;;  %v498_v11 = vrot.slane %v456_v9, %v1343_v6 }
 0x12c   : > { %v458_v12 = vpop.xlane.xlu0 %457 }
 0x12d   : > { %v516_v13 = vsel %vm515_vm5, %v498_v11, %v514_v10  ;;  %v502_v14 = vrot.slane %v458_v12, %v1343_v6 }
 0x12e   : > { %v460_v15 = vpop.xlane.xlu1 %459 }
 0x12f   : > { %v506_v16 = vrot.slane %v460_v15, %v1343_v6  ;;  %v518_v17 = vsel %vm517_vm6, %v502_v14, %v516_v13 }
 0x131   : > { %v520_v18 = vsel %vm519_vm7, %v506_v16, %v518_v17 }
 0x132   : > { %v522_v19 = vsel %vm466_vm8, %v520_v18, -1e+30 }
 0x133   : > { %v525_v20 = vsel %vm524_vm9, %v522_v19, -inf }
 0x134   : > { %526 = vmax.xlane.f32.xlu0 %v525_v20 }
 0x1c1   : > { %v527_v24 = vpop.xlane.xlu0 %526 }
 0x1c2   : > { %v528_v6 = vmax.f32 %v523_v23, %v527_v24 }
 0x1c4   : > { %v529_v25 = vsub.f32 %v523_v23, %v528_v6  ;;  %631 = vst.msk [vmem:[#allocation2] sm:$0xff] %vm318_vm0, %v528_v6  ;;  %534 = vperm.xlu1 %894, %v528_v6  }
 0x1c6   : > { %v530_v31 = vmul.f32 1.442695, %v529_v25 }
 0x243   : > { %v535_v26 = vpop.permute.xlu1 %534 }
 0x244   : > { %v537_v27 = vsub.f32 %v522_v19, %v535_v26 }
 0x246   : > { %v538_v28 = vmul.f32 1.442695, %v537_v27 }
 0x248   : > { %913 = vpow2.f32 %v538_v28 }
 0x249   : > { %915 = vpow2.f32 %v530_v31 }
 0x252   : > { %v914_v29 = vpop.eup %913 }
 0x253   : > { %815 = vmatmul.mubr.msk.f32.vlgmr.msra.gmra.mrb[0].mxu0 %vm524_vm9, %v914_v29  ;;  %v542_v30 = vsel %vm524_vm9, %v914_v29, 0.0  ;;  %v916_v32 = vpop.eup %915 }
 0x254   : > { %543 = vadd.xlane.f32.xlu0 %v542_v30  ;;  %v541_v34 = vmul.f32 %v916_v32, %v540_v33 }
 0x26a   : > { %551 = vperm.xlu0 %895, %v916_v32  }
 0x2e1   : > { %v544_v35 = vpop.xlane.xlu0 %543 }
 0x2e2   : > { %v545_v36 = vadd.f32 %v544_v35, %v541_v34 }
 0x2e4   : > { %547 = vst.msk [vmem:[#allocation3] sm:$0xff] %vm318_vm0, %v545_v36 }
 0x2e9   : > { %v552_v41 = vpop.permute.xlu0 %551 }
 0x2ea   : > { %v554_v42 = vmul.f32 0.0, %v552_v41 }
 0x2eb   : > { %v635_v37 = vld [vmem:[#allocation3] sm:$0xff] }
 0x2ec   : > { %917 = vrcp.f32 %v635_v37 }
 0x2f6   : > { %v918_v38 = vpop.eup %917 }
 0x2f7   : > { %641 = vperm.xlu1 %894, %v918_v38  }
 0x326   : > { %v625_v39 = vpop.f32.mrb[0].mxu0 }
 0x327   : > { %v816_v40 = vpop.f32.mrb[1].mxu0  ;;  %v629_v43 = vadd.f32 %v625_v39, %v554_v42 }
 0x376   : > { %v642_v44 = vpop.permute.xlu1 %641 }
 0x377   : > { %v644_v45 = vmul.f32 %v642_v44, %v629_v43 }
 0x379   : > { %645 = vst [vmem:[%s313_s14] sm:$0xff] %v644_v45 }
 0x37a   : > { %1022 = shalt.err (!%p1019_p13)
}
 0x37b   : > { %s1023_s10 = scalar_lea.hbm %s1370_s1, 128  ;;  %s1027_s20 = scalar_lea.hbm %s1423_s4, 256 }
 0x37c   : > { %p1024_p11 = scmp.ne.s32.totalorder %s1370_s1, %s1023_s10  ;;  %p1028_p7 = scmp.lt.u32.totalorder %s1370_s1, %s1423_s4 }
 0x37d   : > { %p1029_p3 = scmp.lt.u32.totalorder %s1027_s20, %s1023_s10  ;;  %p1031_p4 = scmp.lt.u32.totalorder %s1023_s10, %s1370_s1 }
 0x37e   : > { %p1025_p2 = pnand %p1024_p11, %p1451_p10 }
 0x37f   : > { %p1030_p0 = por %p1029_p3, %p1028_p7 }
 0x380   : > { %p1026_p5 = pneg %p1025_p2 }
 0x381   : > { %p1032_p12 = por %p1031_p4, %p1030_p0 }
 0x383   : > { %p1033_p1 = pnand %p1032_p12, %p1026_p5 }
 0x385   : > { %1036 = shalt.err (!%p1033_p1)
}
 0x386   : > { %823 = dma.vmem_to_hbm [thread:$0]  (%p1451_p10), %s1372_s11, 128, %s1370_s1, %s647_s7  }
 0x387 PF: > { %s1452_s22 = sld [smem:[#allocation16_spill]]  ;;  %s673_s24 = sand.u32 1, %s1075_s15  }
 0x388   : > { %p1453_p8 = scmp.ne.s32.totalorder %s1440_s30, 0  ;;  %s674_s21 = scalar_lea.sflag [#allocation7], %s673_s24 }
 0x38d   : > { %p1454_p9 = scmp.ge.s32.totalorder %s1452_s22, 2 }
 0x38f   : > { %p836_p6 = pnand %p1454_p9, %p1453_p8 }
 0x391   : > { %1070 = dma.done.wait (!%p836_p6), %s674_s21, 128  }
 0x392   : > { %1072 = vsyncadd (!%p836_p6), %s674_s21, 4294967168  ;;  %s23_s20 = sadd.s32 1, %s1452_s22   ;;  %s1455_s28 = sld [smem:[#allocation18_spill]] }
 0x393   : > { %p20_p13 = scmp.ge.s32.totalorder %s23_s20, 4   ;;  %s1456_s18 = sld [smem:[#allocation15_spill]] }
 0x394   : > { %s1457_s19 = sld [smem:[#allocation17_spill]]  ;;  %s1458_s15 = smov %s1079_s16 }
 0x395   : > { %s1459_s16 = smov %s1083_s17  ;;  %22 = sbr.rel (!%p20_p13) target bundleno = 10 (0xa), region = 113 }
 0x398   : > { %s1460_s17 = smov %s1455_s28 }
 0x39c   :  { %679 = vsyncpa [#allocation6], 1 }
 0x39d   :  { %681 = vsyncpa [#allocation6 + $0x1], 1 }
 0x39e   :  { %682 = vsyncpa [#allocation9], 1 }
 0x39f   :  { %684 = vsyncpa [#allocation9 + $0x1], 1 }
 0x3a0   :  { %685 = vsyncpa [#allocation7], 1 }
 0x3a1   :  { %687 = vsyncpa [#allocation7 + $0x1], 1 }

</bundles_post_ra>
